<compile_context>
chip_gen: v5e
topology: v5e:2x2
jax: 0.10.0
libtpu: 0.0.40
codegen_flags: <defaults>
</compile_context>

<pallas_src>
import jax
import jax.numpy as jnp
from jax import lax
from jax.experimental import pallas as pl
from jax.experimental.pallas import tpu as pltpu

# Above the 16/32 MiB scoped defaults, below physical VMEM on v5e/v6e (128 MiB)
# and v7x (64 MiB).
_VMEM_LIMIT_BYTES = 48 * 1024 * 1024


def _cdiv(a, b):
    return -(-a // b)


def _round_up(a, b):
    return _cdiv(a, b) * b


# ---------------------------------------------------------------------------
# Conv path: 3x3 / stride 2 / pad 1 as one matmul per tile with K = 9*Cin
# ---------------------------------------------------------------------------
def _conv_kernel(x_ref, w_ref, b_ref, o_ref, acc_ref):
    # x_ref:   (1, kt, TILE_M)   tap-folded input tile (K = 9*Cin, spatial in lanes)
    # w_ref:   (Cout, kt)        weight slice
    # b_ref:   (Cout, 1)         bias (f32)
    # o_ref:   (1, Cout, TILE_M) NCHW-ordered output tile (lane-dense)
    # acc_ref: (Cout, TILE_M)    f32 accumulator scratch
    k = pl.program_id(2)

    @pl.when(k == 0)
    def _init():
        acc_ref[...] = jnp.zeros_like(acc_ref)

    acc_ref[...] += jnp.dot(w_ref[...], x_ref[0],
                            preferred_element_type=jnp.float32)

    @pl.when(k == pl.num_programs(2) - 1)
    def _finalize():
        o_ref[0] = (acc_ref[...] + b_ref[...]).astype(o_ref.dtype)


def downsample_conv(x_nchw, w_oihw, bias, *, tile_m=512,
                    k_tile_budget_bytes=14 * 1024 * 1024, compute_dtype=None):
    """Conv2d(Cin, Cout, 3, stride=2, padding=1) on NCHW input, NCHW output."""
    N, Cin, H, W = x_nchw.shape
    Cout = w_oihw.shape[0]
    Hout = (H + 2 - 3) // 2 + 1
    Wout = (W + 2 - 3) // 2 + 1
    M = Hout * Wout

    # Tap slabs folded into the contraction dim: (N, 9*Cin, M).  Column index of
    # the folded K axis is t*Cin + c with t = kh*3 + kw.
    xpad = jnp.pad(x_nchw, ((0, 0), (0, 0), (1, 1), (1, 1)))
    slabs = [xpad[:, :, kh:kh + 2 * Hout:2, kw:kw + 2 * Wout:2]
             for kh in range(3) for kw in range(3)]
    taps = jnp.stack(slabs, axis=1).reshape(N, 9 * Cin, M)

    # (Cout, Cin, kh, kw) -> (Cout, kh, kw, Cin) -> (Cout, 9*Cin): matches taps.
    w_r = jnp.transpose(w_oihw, (0, 2, 3, 1)).reshape(Cout, 9 * Cin)
    if compute_dtype is not None:
        taps = taps.astype(compute_dtype)
        w_r = w_r.astype(compute_dtype)
    b_r = bias.astype(jnp.float32).reshape(Cout, 1)

    # Lane tile: always 128-aligned so output stores are lane-dense.
    tm = min(tile_m, _round_up(M, 128))
    m_pad = _round_up(M, tm)
    if m_pad != M:
        taps = jnp.pad(taps, ((0, 0), (0, 0), (0, m_pad - M)))

    # K tile: keep the double-buffered tap + weight blocks within a VMEM budget.
    itemsize = jnp.dtype(taps.dtype).itemsize
    K = 9 * Cin
    kt_max = max(128,
                 (k_tile_budget_bytes // (2 * (tm + Cout) * itemsize)) // 128 * 128)
    if K <= kt_max:
        kt, k_pad = K, K
    else:
        kt = _round_up(_cdiv(K, _cdiv(K, kt_max)), 128)
        k_pad = _round_up(K, kt)
        taps = jnp.pad(taps, ((0, 0), (0, k_pad - K), (0, 0)))
        w_r = jnp.pad(w_r, ((0, 0), (0, k_pad - K)))

    out_itemsize = jnp.dtype(x_nchw.dtype).itemsize
    cost = pl.CostEstimate(
        flops=2 * N * m_pad * k_pad * Cout,
        transcendentals=0,
        bytes_accessed=(taps.size * itemsize
                        + w_r.size * jnp.dtype(w_r.dtype).itemsize
                        + b_r.size * 4
                        + N * Cout * m_pad * out_itemsize),
    )

    out = pl.pallas_call(
        _conv_kernel,
        out_shape=jax.ShapeDtypeStruct((N, Cout, m_pad), x_nchw.dtype),
        grid_spec=pltpu.PrefetchScalarGridSpec(
            num_scalar_prefetch=0,
            grid=(N, m_pad // tm, k_pad // kt),          # K (usually 1 step) last
            in_specs=[
                pl.BlockSpec((1, kt, tm), lambda n, m, k: (n, k, m)),
                pl.BlockSpec((Cout, kt), lambda n, m, k: (0, k)),
                pl.BlockSpec((Cout, 1), lambda n, m, k: (0, 0)),
            ],
            out_specs=pl.BlockSpec((1, Cout, tm), lambda n, m, k: (n, 0, m)),
            scratch_shapes=[pltpu.VMEM((Cout, tm), jnp.float32)],
        ),
        compiler_params=pltpu.CompilerParams(
            dimension_semantics=("parallel", "parallel", "arbitrary"),
            vmem_limit_bytes=_VMEM_LIMIT_BYTES),
        cost_estimate=cost,
    )(taps, w_r, b_r)

    if m_pad != M:
        out = out[:, :, :M]
    return out.reshape(N, Cout, Hout, Wout)              # NCHW directly (free reshape)


# ---------------------------------------------------------------------------
# AvgPool path: grouped rows (lane-dense output) + one matmul vs pooling matrix
# ---------------------------------------------------------------------------
def _avgpool_kernel(x_ref, p_ref, o_ref):
    # x_ref: (1, TRG, K)  one group-row = g output rows' 2x2-window inputs (K = 4*g*Wout)
    # p_ref: (K, Q)       constant 0.25 / 0 pooling matrix, Q = g*Wout (lane-dense)
    # o_ref: (1, TRG, Q)
    s = jnp.dot(x_ref[0].astype(jnp.float32), p_ref[...],
                preferred_element_type=jnp.float32)
    o_ref[0] = s.astype(o_ref.dtype)


def downsample_avgpool(x_nchw, *, vmem_budget_bytes=8 * 1024 * 1024):
    """AvgPool2d(kernel_size=2, stride=2) on NCHW input, NCHW output."""
    N, C, H, W = x_nchw.shape
    Hout, Wout = H // 2, W // 2                           # floor (AvgPool2d semantics)
    W2 = 2 * Wout
    xc = x_nchw[:, :, :2 * Hout, :2 * Wout]               # no-op slice when H, W even
    R = C * Hout
    # Metadata-only reshape: row r = (c, i_out) holds input rows 2*i_out, 2*i_out+1.
    xr = xc.reshape(N, R, 2 * W2)

    # Group g consecutive output rows per kernel row -> output lane width g*Wout.
    if Wout >= 128:
        g = 1
    else:
        g = _cdiv(128, Wout)
        for cand in range(g, min(4 * g, 128) + 1):        # prefer a 128-multiple
            if (cand * Wout) % 128 == 0:
                g = cand
                break
    K = 2 * g * W2                                         # = 4 * g * Wout
    Q = g * Wout
    RG = _cdiv(R, g)

    # Row-group tile bounded by a VMEM budget (double-buffered input blocks).
    itemsize = jnp.dtype(x_nchw.dtype).itemsize
    trg_cap = max(8, (vmem_budget_bytes // (2 * K * itemsize)) // 8 * 8)
    trg_cap = min(trg_cap, 512)
    if RG <= trg_cap:
        trg, rg_pad = RG, RG
    else:
        trg = trg_cap
        rg_pad = _round_up(RG, trg)

    r_pad = rg_pad * g
    if r_pad != R:
        xr = jnp.pad(xr, ((0, 0), (0, r_pad - R), (0, 0)))
    xg = xr.reshape(N, rg_pad, K)                          # free reshape

    # Pooling matrix: group-row position k = (row_in_group, which_input_row, col);
    # it feeds output q = row_in_group*Wout + col//2 with weight 0.25.
    kk = jnp.arange(K)
    qq = jnp.arange(Q)
    tgt = (kk // (2 * W2)) * Wout + (kk % W2) // 2
    pool_mat = jnp.where(qq[None, :] == tgt[:, None], 0.25, 0.0).astype(jnp.float32)

    cost = pl.CostEstimate(
        flops=2 * N * rg_pad * K * Q,
        transcendentals=0,
        bytes_accessed=(N * rg_pad * K * itemsize + pool_mat.size * 4
                        + N * rg_pad * Q * itemsize),
    )

    out = pl.pallas_call(
        _avgpool_kernel,
        out_shape=jax.ShapeDtypeStruct((N, rg_pad, Q), x_nchw.dtype),
        grid_spec=pltpu.PrefetchScalarGridSpec(
            num_scalar_prefetch=0,
            grid=(N, rg_pad // trg),
            in_specs=[
                pl.BlockSpec((1, trg, K), lambda n, r: (n, r, 0)),
                pl.BlockSpec((K, Q), lambda n, r: (0, 0)),
            ],
            out_specs=pl.BlockSpec((1, trg, Q), lambda n, r: (n, r, 0)),
        ),
        compiler_params=pltpu.CompilerParams(
            dimension_semantics=("parallel", "parallel"),
            vmem_limit_bytes=_VMEM_LIMIT_BYTES),
        cost_estimate=cost,
    )(xg, pool_mat)

    out = out.reshape(N, rg_pad * g, Wout)[:, :R, :]       # free reshape + slice
    return out.reshape(N, C, Hout, Wout)                   # NCHW directly


# ---------------------------------------------------------------------------
# Module-level forward
# ---------------------------------------------------------------------------
def downsample_forward(x_nchw, *, use_conv, weight=None, bias=None, freq_space=False):
    """Forward of Downsample(channels, use_conv, out_channel)."""
    if freq_space:
        # TODO(synk): freq_space=True path (Haar / inverse-Haar transforms) not implemented.
        raise NotImplementedError("freq_space=True (Haar transforms) is not supported")
    if use_conv:
        return downsample_conv(x_nchw, weight, bias)
    return downsample_avgpool(x_nchw)


# ---------------------------------------------------------------------------
# Demo / self-check
# ---------------------------------------------------------------------------
if __name__ == "__main__":
    key = jax.random.PRNGKey(0)
    k_x, k_w, k_b = jax.random.split(key, 3)

    N, C, H, W = 2, 4, 16, 16
    Cout = 8

    x = jax.random.normal(k_x, (N, C, H, W), dtype=jnp.float32)
    w = jax.random.normal(k_w, (Cout, C, 3, 3), dtype=jnp.float32) * 0.1
    b = jax.random.normal(k_b, (Cout,), dtype=jnp.float32) * 0.1

    # --- use_conv=True path (Conv2d 3x3, stride 2, pad 1) ---
    y_conv = downsample_forward(x, use_conv=True, weight=w, bias=b)
    y_conv = jax.block_until_ready(y_conv)

    ref_conv = lax.conv_general_dilated(
        x, w, window_strides=(2, 2), padding=((1, 1), (1, 1)),
        dimension_numbers=("NCHW", "OIHW", "NCHW"),
    ) + b.reshape(1, Cout, 1, 1)
    assert y_conv.shape == (N, Cout, H // 2, W // 2)
    assert jnp.allclose(y_conv, ref_conv, atol=1e-4, rtol=1e-4)

    # --- use_conv=False path (AvgPool2d 2x2, channels == out_channel) ---
    y_pool = downsample_forward(x, use_conv=False)
    y_pool = jax.block_until_ready(y_pool)

    ref_pool = x.reshape(N, C, H // 2, 2, W // 2, 2).mean(axis=(3, 5))
    assert y_pool.shape == (N, C, H // 2, W // 2)
    assert jnp.allclose(y_pool, ref_pool, atol=1e-4, rtol=1e-4)

    print("KERNEL_OK")
</pallas_src>

<mosaic_0001>
module attributes {stable_mosaic.version = 11 : i64} {
  func.func @_conv_kernel(%arg0: i32, %arg1: i32, %arg2: i32, %arg3: memref<1x36x128xf32, #tpu.memory_space<vmem>>, %arg4: memref<8x36xf32, #tpu.memory_space<vmem>>, %arg5: memref<8x1xf32, #tpu.memory_space<vmem>>, %arg6: memref<1x8x128xf32, #tpu.memory_space<vmem>>, %arg7: memref<8x128xf32, #tpu.memory_space<vmem>>) attributes {dimension_semantics = [#tpu.dimension_semantics<parallel>, #tpu.dimension_semantics<parallel>, #tpu.dimension_semantics<arbitrary>], iteration_bounds = array<i64: 2, 1, 1>, scalar_prefetch = 0 : i64, scratch_operands = 1 : i64, tpu.core_type = #tpu.core_type<tc>, window_params = [{transform_indices = @transform_0, window_bounds = array<i64: 1, 36, 128>}, {transform_indices = @transform_1, window_bounds = array<i64: 8, 36>}, {pipeline_mode = #tpu.pipeline_mode<synchronous>, transform_indices = @transform_2, window_bounds = array<i64: 8, 1>}, {transform_indices = @transform_3, window_bounds = array<i64: 1, 8, 128>}]} {
    %c0_i32 = arith.constant 0 : i32
    %0 = arith.cmpi eq, %arg2, %c0_i32 : i32
    %1 = arith.extui %0 : i1 to i32
    %c0_i32_0 = arith.constant 0 : i32
    %2 = arith.cmpi ne, %1, %c0_i32_0 : i32
    scf.if %2 {
      %cst_11 = arith.constant 0.000000e+00 : f32
      %13 = vector.broadcast %cst_11 : f32 to vector<8x128xf32>
      %c0_12 = arith.constant 0 : index
      %c0_13 = arith.constant 0 : index
      %14 = vector.load %arg7[%c0_12, %c0_13] : memref<8x128xf32, #tpu.memory_space<vmem>>, vector<8x128xf32>
      tpu.vector_store %arg7[%c0_12, %c0_13], %13 {strides = array<i32>} : memref<8x128xf32, #tpu.memory_space<vmem>>, vector<8x128xf32>,
    } else {
    }
    %c0 = arith.constant 0 : index
    %c0_1 = arith.constant 0 : index
    %3 = vector.load %arg7[%c0, %c0_1] : memref<8x128xf32, #tpu.memory_space<vmem>>, vector<8x128xf32>
    %c0_2 = arith.constant 0 : index
    %c0_3 = arith.constant 0 : index
    %4 = vector.load %arg4[%c0_2, %c0_3] : memref<8x36xf32, #tpu.memory_space<vmem>>, vector<8x36xf32>
    %c0_4 = arith.constant 0 : index
    %c0_5 = arith.constant 0 : index
    %c0_6 = arith.constant 0 : index
    %5 = vector.load %arg3[%c0_4, %c0_5, %c0_6] : memref<1x36x128xf32, #tpu.memory_space<vmem>>, vector<1x36x128xf32>
    %6 = vector.shape_cast %5 : vector<1x36x128xf32> to vector<36x128xf32>
    %cst = arith.constant dense<0.000000e+00> : vector<8x128xf32>
    %7 = tpu.matmul %4, %6, %cst {dimension_numbers = #tpu.dot_dimension_numbers<[1], [0], [0], [1], [0, 0, 1, 1], [], []>} : vector<8x36xf32>, vector<36x128xf32>, vector<8x128xf32> -> vector<8x128xf32>
    %8 = arith.addf %3, %7 : vector<8x128xf32>
    %c0_7 = arith.constant 0 : index
    %c0_8 = arith.constant 0 : index
    %9 = vector.load %arg7[%c0_7, %c0_8] : memref<8x128xf32, #tpu.memory_space<vmem>>, vector<8x128xf32>
    tpu.vector_store %arg7[%c0_7, %c0_8], %8 {strides = array<i32>} : memref<8x128xf32, #tpu.memory_space<vmem>>, vector<8x128xf32>,
    %c0_i32_9 = arith.constant 0 : i32
    %10 = arith.cmpi eq, %arg2, %c0_i32_9 : i32
    %11 = arith.extui %10 : i1 to i32
    %c0_i32_10 = arith.constant 0 : i32
    %12 = arith.cmpi ne, %11, %c0_i32_10 : i32
    scf.if %12 {
      %c0_11 = arith.constant 0 : index
      %c0_12 = arith.constant 0 : index
      %13 = vector.load %arg7[%c0_11, %c0_12] : memref<8x128xf32, #tpu.memory_space<vmem>>, vector<8x128xf32>
      %c0_13 = arith.constant 0 : index
      %c0_14 = arith.constant 0 : index
      %14 = vector.load %arg5[%c0_13, %c0_14] : memref<8x1xf32, #tpu.memory_space<vmem>>, vector<8x1xf32>
      %15 = vector.broadcast %14 : vector<8x1xf32> to vector<8x128xf32>
      %16 = arith.addf %13, %15 : vector<8x128xf32>
      %c0_15 = arith.constant 0 : index
      %c0_16 = arith.constant 0 : index
      %c0_17 = arith.constant 0 : index
      %17 = vector.load %arg6[%c0_15, %c0_16, %c0_17] : memref<1x8x128xf32, #tpu.memory_space<vmem>>, vector<1x8x128xf32>
      %18 = vector.shape_cast %17 : vector<1x8x128xf32> to vector<8x128xf32>
      %19 = vector.shape_cast %16 : vector<8x128xf32> to vector<1x8x128xf32>
      tpu.vector_store %arg6[%c0_15, %c0_16, %c0_17], %19 {strides = array<i32>} : memref<1x8x128xf32, #tpu.memory_space<vmem>>, vector<1x8x128xf32>,
    } else {
    }
    return
  }
  func.func @transform_0(%arg0: i32, %arg1: i32, %arg2: i32) -> (i32, i32, i32) {
    %c0_i32 = arith.constant 0 : i32
    return %arg0, %arg2, %arg1 : i32, i32, i32
  }
  func.func @transform_1(%arg0: i32, %arg1: i32, %arg2: i32) -> (i32, i32) {
    %c0_i32 = arith.constant 0 : i32
    %c0_i32_0 = arith.constant 0 : i32
    return %c0_i32, %arg2 : i32, i32
  }
  func.func @transform_2(%arg0: i32, %arg1: i32, %arg2: i32) -> (i32, i32) {
    %c0_i32 = arith.constant 0 : i32
    %c0_i32_0 = arith.constant 0 : i32
    %c0_i32_1 = arith.constant 0 : i32
    return %c0_i32, %c0_i32_0 : i32, i32
  }
  func.func @transform_3(%arg0: i32, %arg1: i32, %arg2: i32) -> (i32, i32, i32) {
    %c0_i32 = arith.constant 0 : i32
    %c0_i32_0 = arith.constant 0 : i32
    return %arg0, %c0_i32, %arg1 : i32, i32, i32
  }
}

</mosaic_0001>

<bundles_post_ra>
// kernel: tpu_custom_call.1
= control target key start
LH: loop header
LB: loop body
LE: loop exit
PB: predicated region body
PF: predicated region fallthrough
CT: control target
= control target key end

     0   :  { %8 = vsyncpa [#allocation4], 0  ;;  %s676_s0 = inlined_call_operand.vmem [shape: f32[2,36,128], index: 0, kind: input, shape index: {}]   ;;  %s677_s1 = inlined_call_operand.vmem [shape: f32[8,36], index: 1, kind: input, shape index: {}]   ;;  %s678_s2 = inlined_call_operand.vmem [shape: f32[8,1], index: 2, kind: input, shape index: {}]   ;;  %s679_s3 = inlined_call_operand.hbm [shape: f32[2,8,128], index: 3, kind: output, shape index: {}]  }
   0x1   :  { %10 = vsyncpa [#allocation4 + $0x1], 0  ;;  %s573_s12 = smov 0   ;;  %s575_s13 = smov 0  }
   0x2   :  { %s577_s14 = smov 0   ;;  %s579_s15 = smov 0  }
   0x3   :  { %s581_s16 = smov 0   ;;  %s583_s17 = smov 0  }
   0x4 LB: > { %s400_s18 = sadd.s32 4294967295, %s550_s17   ;;  %s401_s19 = sadd.s32 4294967294, %s550_s17   ;;  %s550_s17 = sphi %s583_s17, %s16_s17   ;;  %s546_s16 = sphi %s581_s16, %s686_s16   ;;  %s542_s15 = sphi %s579_s15, %s685_s15   ;;  %s538_s14 = sphi %s577_s14, %s684_s14   ;;  %s534_s13 = sphi %s575_s13, %s683_s13   ;;  %s530_s12 = sphi %s573_s12, %s682_s12  }
   0x5   : > { %s35_s20 = sadd.s32 1, %s546_s16  ;;  %s121_s21 = sadd.s32 1, %s538_s14 }
   0x6   : > { %p37_p0 = scmp.ge.s32.totalorder %s35_s20, 2  ;;  %p131_p1 = scmp.ne.s32.totalorder %s538_s14, %s534_s13 }
   0x7   : > { %p132_p2 = scmp.eq.s32.totalorder %s400_s18, 1  ;;  %p137_p3 = scmp.ne.s32.totalorder %s534_s13, %s530_s12 }
   0x8   : > { %s688_s20 = smov (%p37_p0, %s35_s20), 0  ;;  %p138_p5 = scmp.eq.s32.totalorder %s401_s19, 1 }
   0x9   : > { %p613_p4 = por %p132_p2, %p131_p1  ;;  %s116_s23 = ssub.s32 %s546_s16, %s688_s20 }
   0xa   : > { %p405_p6 = scmp.ge.s32.totalorder %s550_s17, 1  ;;  %p119_p7 = scmp.eq.s32.totalorder %s116_s23, 0 }
   0xb   : > { %p620_p8 = por %p138_p5, %p137_p3  ;;  %p182_p9 = scmp.lt.s32.totalorder %s550_s17, 3 }
   0xc   : > { %s626_s25 = scalar_select %p119_p7, %s538_s14, %s121_s21  }
   0xd   : > { %p183_p10 = pnand %p405_p6, %p182_p9 }
   0xe   : > { %p218_p11 = scmp.lt.s32.totalorder (!%p183_p10), %s542_s15, 1  ;;  %s214_s8 = sand.u32 (!%p183_p10), 1, %s534_s13  }
   0xf   : > { %186 = sbr.rel (%p183_p10) target bundleno = 166 (0xa6), region = 32  ;;  %s406_s9 = sshll.u32 (!%p183_p10), %s214_s8, 3 }
  0x10   : > { %s411_s10 = sshll.u32 (!%p183_p10), %s542_s15, 3  ;;  %s216_s21 = scalar_lea.vmem (!%p183_p10), [#allocation3], %s406_s9 }
  0x11   : > { %s300_s19 = scalar_lea.hbm (!%p183_p10), %s679_s3, %s411_s10  ;;  %s302_s23 = sshll.u32 (!%p183_p10), %s216_s21, 4  ;;  %s303_s23 = int_to_ptr.vmem [resolvable:$true] %s302_s23 }
  0x12   : > { %s304_s26 = sshll.u32 (!%p183_p10), %s300_s19, 4  ;;  %s289_s27 = scalar_lea.sflag (!%p183_p10), [#allocation4], %s214_s8  ;;  %s305_s26 = int_to_ptr.hbm [resolvable:$true] %s304_s26 }
  0x13   : > { %s492_s4 = scalar_lea.hbm (!%p183_p10), %s679_s3, 16 }
  0x14   : > { %v280_v0 = vld [vmem:[%s678_s2] sm:$0xff]  ;;  %v552_v1 = vmov 0   ;;  %s219_s28 = scalar_select %p218_p11, %s542_s15, 1  ;;  %vm250_vm0 = vcmask 1043456   ;;  %vm246_vm1 = vcmask 293888  }
  0x15   : > { %471 = vset.pattern.permute.xlu0 %v552_v1  ;;  %v240_v7 = vld [vmem:[%s677_s1] sm:$0xff] }
  0x16   : > { %283 = vperm.xlu0 %471, %v280_v0   ;;  %s414_s29 = smul.u32 40, %s219_s28  ;;  %s486_s28 = sshra.s32 %s305_s26, 4  ;;  %s487_s28 = int_to_ptr.hbm [resolvable:$true] %s486_s28 }
  0x17   : > { %p493_p1 = scmp.lt.s32.totalorder %s487_s28, %s679_s3 }
  0x18   : > { %s228_s5 = scalar_lea.vmem %s676_s0, %s414_s29  ;;  %s488_s29 = scalar_lea.hbm %s487_s28, 8 }
  0x19   : > { %v245_v2 = vld [vmem:[%s228_s5 + $0x20] sm:$0xf]  ;;  %v244_v3 = vld [vmem:[%s228_s5 + $0x18] sm:$0xff]  ;;  %v243_v4 = vld [vmem:[%s228_s5 + $0x10] sm:$0xff]  ;;  %p489_p12 = scmp.ne.s32.totalorder %s487_s28, %s488_s29  ;;  %p494_p2 = scmp.lt.s32.totalorder %s492_s4, %s488_s29 }
  0x1a   : > { %408 = vmatpush.msk.msra.mxu0 %vm250_vm0, %v245_v2  ;;  %v242_v5 = vld [vmem:[%s228_s5 + $0x8] sm:$0xff]  ;;  %v241_v6 = vld [vmem:[%s228_s5] sm:$0xff] }
  0x1b   : > { %p490_p13 = pnand %p489_p12, %p613_p4  ;;  %p495_p3 = por %p494_p2, %p493_p1 }
  0x1c   : > { %266 = vmatpush.msra.mxu0 %v244_v3 }
  0x1d   : > { %p491_p0 = pneg %p490_p13 }
  0x1e   : > { %267 = vmatpush.msra.mxu0 %v243_v4 }
  0x1f   : > { %p496_p5 = pnand %p495_p3, %p491_p0 }
  0x20   : > { %268 = vmatpush.msra.mxu0 %v242_v5 }
  0x22   : > { %269 = vmatpush.msra.mxu0 %v241_v6 }
  0x23   : > { %409 = vmatmul.msk.f32.vlgmr.msra.gmra.mxu0 %vm246_vm1, %v240_v7 }
  0x88   : > { %v284_v8 = vpop.permute.xlu0 %283 }
  0xa0   : > { %v271_v9 = vpop.f32.mrf.mxu0 }
  0xa1   : > { %v286_v10 = vadd.f32 %v284_v8, %v271_v9 }
  0xa3   : > { %287 = vst [vmem:[%s216_s21] sm:$0xff] %v286_v10 }
  0xa4   : > { %499 = shalt.err (!%p496_p5)
}
  0xa5   : > { %415 = dma.vmem_to_hbm [thread:$0]  (%p613_p4), %s303_s23, 128, %s305_s26, %s289_s27  }
  0xa6 PF: > { %p421_p6 = scmp.ge.s32.totalorder %s550_s17, 2  ;;  %s316_s7 = sand.u32 1, %s530_s12  }
  0xa7   : > { %s317_s8 = scalar_lea.sflag [#allocation4], %s316_s7 }
  0xa8   : > { %p418_p7 = pnand %p421_p6, %p620_p8 }
  0xaa   : > { %p419_p9 = pneg %p418_p7 }
  0xac   : > { %525 = dma.done.wait (%p419_p9), %s317_s8, 128  }
  0xad   : > { %527 = vsyncadd (%p419_p9), %s317_s8, 4294967168  ;;  %s16_s17 = sadd.s32 1, %s550_s17   ;;  %s682_s12 = smov %s534_s13 }
  0xae   : > { %p13_p10 = scmp.ge.s32.totalorder %s16_s17, 4   ;;  %s683_s13 = smov %s538_s14 }
  0xaf   : > { %s684_s14 = smov %s626_s25  ;;  %s685_s15 = smov %s546_s16 }
  0xb0   : > { %s686_s16 = smov %s688_s20  ;;  %15 = sbr.rel (!%p13_p10) target bundleno = 4 (0x4), region = 78 }
  0xb5   :  { %323 = vsyncpa [#allocation4], 1 }
  0xb6   :  { %325 = vsyncpa [#allocation4 + $0x1], 1 }

</bundles_post_ra>
